<compile_context>
chip_gen: v7x
topology: tpu7x:2x2x1
jax: 0.10.0
libtpu: 0.0.40
codegen_flags: <defaults>
</compile_context>

<pallas_src>
import functools
import math

import jax
import jax.numpy as jnp
from jax.experimental import pallas as pl
from jax.experimental.pallas import tpu as pltpu

_HALF_LOG_2PI = 0.5 * math.log(2.0 * math.pi)


def _round_up(x, m):
    return (x + m - 1) // m * m


def _cdiv(a, b):
    return (a + b - 1) // b


def _elem_loss_f32(x, t):
    """Per-element loss in f32 (fused-log form). Shared by the kernel and the
    padded-element constant so the padding correction is exact."""
    H = jnp.maximum(x, jnp.float32(0.01))
    O = jnp.maximum(t, jnp.float32(0.01))
    # Single log of H: nll - 0.5*log(H) ~= H - (O + 0.5)*log(H + 1e-8).
    # H >= 0.01 so the deviation from torch's exact eps handling is < 5e-7.
    log_H = jnp.log(H + jnp.float32(1e-8))
    log_O = jnp.log(O)
    stirling = jnp.where(
        O > 1.0,
        (O + 0.5) * log_O - O + jnp.float32(_HALF_LOG_2PI),
        jnp.float32(0.0),
    )
    return H - (O + 0.5) * log_H + stirling


def _poisson_match_loss_kernel(x_ref, t_ref, out_ref, *, nchunks, chunk_rows):
    # x_ref, t_ref : VMEM tiles (tb, N_pad) of `input` / `target`
    # out_ref      : VMEM (8, N_pad) per-grid-step partial-sum block
    n = out_ref.shape[-1]

    def chunk_partial(c):
        # chunk_rows is aligned to the packed (32-bit) sublane tile of the
        # input dtype, so dynamic row slices never straddle a packed tile.
        r = pl.multiple_of(c * chunk_rows, chunk_rows)
        x = x_ref[pl.ds(r, chunk_rows), :].astype(jnp.float32)
        t = t_ref[pl.ds(r, chunk_rows), :].astype(jnp.float32)
        loss = _elem_loss_f32(x, t)
        if chunk_rows > 8:
            loss = loss.reshape(chunk_rows // 8, 8, n).sum(axis=0)
        return loss

    acc = chunk_partial(0)
    if nchunks > 1:
        acc = jax.lax.fori_loop(
            1,
            nchunks,
            lambda c, a: a + chunk_partial(c),
            acc,
            unroll=min(nchunks - 1, 8),
        )
    out_ref[...] = acc


def _reference(inp, target, weight=1.0):
    """Pure-JAX reference with exact torch semantics (3 separate logs)."""
    H = jnp.maximum(inp, 0.01)
    O = jnp.maximum(target, 0.01)
    nll = H - O * jnp.log(H + 1e-8)
    stirling = jnp.where(
        O > 1.0, O * jnp.log(O) - O + 0.5 * jnp.log(2.0 * jnp.pi * O), 0.0
    )
    loss = nll + stirling - 0.5 * jnp.log(H)
    return jnp.mean(weight * loss)


def poisson_match_loss(inp, target, weight=1.0, *, tb=None,
                       min_pallas_bytes=128 * 1024):
    """Pallas TPU implementation of PoissonMatchLoss.forward (scalar weight)."""
    # TODO(synk): only a scalar `weight` is supported; a per-element weight
    # tensor would need to be passed as a third VMEM input.
    assert inp.shape == target.shape and inp.ndim == 2
    B, N = inp.shape
    itemsize = jnp.dtype(inp.dtype).itemsize

    # Small-problem fallback: pallas_call fixed cost dominates tiny inputs and
    # XLA's fused elementwise reduction wins.
    if min_pallas_bytes and B * N * itemsize < min_pallas_bytes:
        return _reference(
            inp.astype(jnp.float32), target.astype(jnp.float32), weight
        )

    # ---- padding / tiling --------------------------------------------------
    # Lane-dense layout: pad N up to a multiple of 128.
    N_pad = _round_up(N, 128)

    # Row granularity = packed (32-bit) sublane tile of the input dtype:
    # f32 -> 8 rows, bf16/f16 -> 16 rows, int8/fp8 -> 32 rows.
    sub = 8 * max(1, 4 // itemsize)

    # Row tile: ~2 MiB per input tile keeps the double-buffered footprint
    # (2 inputs x 2 buffers) ~8 MiB -- safe under the default scoped-VMEM
    # limit on every generation (incl. v7x's 64 MiB physical VMEM).  Cap the
    # tile so the grid has >= 2 steps whenever B > sub, letting the
    # "parallel" axis shard across both TensorCores on v7x.
    if tb is None:
        target_tile_bytes = 2 * 1024 * 1024
        rows_budget = max(sub, (target_tile_bytes // (itemsize * N_pad)) // sub * sub)
        groups = _cdiv(B, sub)
        cap_two_steps = _cdiv(groups, 2) * sub
        tb = max(sub, min(rows_budget, cap_two_steps))
    assert tb % sub == 0, "row tile must be a multiple of the packed sublane tile"

    B_pad = _round_up(B, tb)
    grid = B_pad // tb

    pad_rows, pad_cols = B_pad - B, N_pad - N
    if pad_rows or pad_cols:
        inp = jnp.pad(inp, ((0, pad_rows), (0, pad_cols)))
        target = jnp.pad(target, ((0, pad_rows), (0, pad_cols)))

    kernel = functools.partial(
        _poisson_match_loss_kernel, nchunks=tb // sub, chunk_rows=sub
    )

    cost = pl.CostEstimate(
        flops=12 * B_pad * N_pad,
        transcendentals=2 * B_pad * N_pad,
        bytes_accessed=2 * B_pad * N_pad * itemsize + grid * 8 * N_pad * 4,
    )

    partials = pl.pallas_call(
        kernel,
        out_shape=jax.ShapeDtypeStruct((grid * 8, N_pad), jnp.float32),
        grid_spec=pltpu.PrefetchScalarGridSpec(
            num_scalar_prefetch=0,
            grid=(grid,),
            in_specs=[
                pl.BlockSpec((tb, N_pad), lambda i: (i, 0)),
                pl.BlockSpec((tb, N_pad), lambda i: (i, 0)),
            ],
            out_specs=pl.BlockSpec((8, N_pad), lambda i: (i, 0)),
        ),
        compiler_params=pltpu.CompilerParams(
            dimension_semantics=("parallel",),  # distinct output block per step
        ),
        cost_estimate=cost,
    )(inp, target)

    total = jnp.sum(partials, dtype=jnp.float32)

    # Padded elements (zeros -> clamp to 0.01) contribute a known constant;
    # subtract it once instead of masking in the hot loop.
    n_pad_elems = B_pad * N_pad - B * N
    if n_pad_elems:
        pad_const = _elem_loss_f32(jnp.float32(0.0), jnp.float32(0.0))
        total = total - jnp.float32(n_pad_elems) * pad_const

    w = jnp.asarray(weight, dtype=jnp.float32)
    return w * total / jnp.float32(B * N)


if __name__ == "__main__":
    # PoissonMatchLoss has no learnable parameters; nothing to initialize.
    key = jax.random.PRNGKey(0)
    keys = jax.random.split(key, 6)

    # (batch of flash hypotheses, number of PMTs)
    B, NPMT = 16, 256
    inp = jax.random.uniform(keys[0], (B, NPMT), jnp.float32, minval=0.0, maxval=50.0)
    tgt = jax.random.uniform(keys[1], (B, NPMT), jnp.float32, minval=0.0, maxval=50.0)
    weight = 1.5

    # Force the Pallas path (min_pallas_bytes=0) so the kernel itself runs.
    out = jax.block_until_ready(
        poisson_match_loss(inp, tgt, weight, min_pallas_bytes=0)
    )
    ref = _reference(inp, tgt, weight)
    assert jnp.allclose(out, ref, rtol=1e-5, atol=1e-4), (out, ref)

    # Ragged batch + non-multiple-of-128 NPMT (exercises row/lane padding and
    # the padded-element constant-subtraction correction).
    B2, N2 = 13, 180
    inp2 = jax.random.uniform(keys[2], (B2, N2), jnp.float32, minval=0.0, maxval=50.0)
    tgt2 = jax.random.uniform(keys[3], (B2, N2), jnp.float32, minval=0.0, maxval=50.0)
    out2 = jax.block_until_ready(poisson_match_loss(inp2, tgt2, min_pallas_bytes=0))
    ref2 = _reference(inp2, tgt2)
    assert jnp.allclose(out2, ref2, rtol=1e-5, atol=1e-4), (out2, ref2)

    # bf16 inputs (half the HBM bytes; in-kernel math stays f32).
    B3, N3 = 64, 256
    inp3 = jax.random.uniform(
        keys[4], (B3, N3), jnp.float32, minval=0.0, maxval=50.0
    ).astype(jnp.bfloat16)
    tgt3 = jax.random.uniform(
        keys[5], (B3, N3), jnp.float32, minval=0.0, maxval=50.0
    ).astype(jnp.bfloat16)
    out3 = jax.block_until_ready(poisson_match_loss(inp3, tgt3, min_pallas_bytes=0))
    ref3 = _reference(inp3.astype(jnp.float32), tgt3.astype(jnp.float32))
    assert jnp.allclose(out3, ref3, rtol=1e-5, atol=1e-4), (out3, ref3)

    # Default small-problem fallback path (pure JAX) on the tiny demo shape.
    out4 = jax.block_until_ready(poisson_match_loss(inp, tgt, weight))
    assert jnp.allclose(out4, ref, rtol=1e-5, atol=1e-4), (out4, ref)

    print("KERNEL_OK")
</pallas_src>

<mosaic_0001>
module attributes {stable_mosaic.version = 11 : i64} {
  func.func @_poisson_match_loss_kernel(%arg0: i32, %arg1: memref<8x256xf32, #tpu.memory_space<vmem>>, %arg2: memref<8x256xf32, #tpu.memory_space<vmem>>, %arg3: memref<8x256xf32, #tpu.memory_space<vmem>>) attributes {dimension_semantics = [#tpu.dimension_semantics<parallel>], iteration_bounds = array<i64: 2>, scalar_prefetch = 0 : i64, scratch_operands = 0 : i64, tpu.core_type = #tpu.core_type<tc>, window_params = [{transform_indices = @transform_0, window_bounds = array<i64: 8, 256>}, {transform_indices = @transform_1, window_bounds = array<i64: 8, 256>}, {transform_indices = @transform_2, window_bounds = array<i64: 8, 256>}]} {
    %c0_i32 = arith.constant 0 : i32
    %0 = tpu.assume_multiple %c0_i32, 8 : i32
    %1 = arith.index_cast %0 : i32 to index
    %c0 = arith.constant 0 : index
    %2 = vector.load %arg1[%1, %c0] : memref<8x256xf32, #tpu.memory_space<vmem>>, vector<8x256xf32>
    %3 = arith.index_cast %0 : i32 to index
    %c0_0 = arith.constant 0 : index
    %4 = vector.load %arg2[%3, %c0_0] : memref<8x256xf32, #tpu.memory_space<vmem>>, vector<8x256xf32>
    %cst = arith.constant 0.00999999977 : f32
    %5 = vector.broadcast %cst : f32 to vector<8x256xf32>
    %6 = arith.maximumf %2, %5 : vector<8x256xf32>
    %cst_1 = arith.constant 0.00999999977 : f32
    %7 = vector.broadcast %cst_1 : f32 to vector<8x256xf32>
    %8 = arith.maximumf %4, %7 : vector<8x256xf32>
    %cst_2 = arith.constant 9.99999993E-9 : f32
    %9 = vector.broadcast %cst_2 : f32 to vector<8x256xf32>
    %10 = arith.addf %6, %9 : vector<8x256xf32>
    %11 = math.log %10 : vector<8x256xf32>
    %12 = math.log %8 : vector<8x256xf32>
    %cst_3 = arith.constant 1.000000e+00 : f32
    %13 = vector.broadcast %cst_3 : f32 to vector<8x256xf32>
    %14 = arith.cmpf ogt, %8, %13 : vector<8x256xf32>
    %cst_4 = arith.constant 5.000000e-01 : f32
    %15 = vector.broadcast %cst_4 : f32 to vector<8x256xf32>
    %16 = arith.addf %8, %15 : vector<8x256xf32>
    %17 = arith.mulf %16, %12 : vector<8x256xf32>
    %18 = arith.subf %17, %8 : vector<8x256xf32>
    %cst_5 = arith.constant 0.918938517 : f32
    %19 = vector.broadcast %cst_5 : f32 to vector<8x256xf32>
    %20 = arith.addf %18, %19 : vector<8x256xf32>
    %cst_6 = arith.constant 0.000000e+00 : f32
    %21 = vector.broadcast %cst_6 : f32 to vector<8x256xf32>
    %22 = arith.select %14, %20, %21 : vector<8x256xi1>, vector<8x256xf32>
    %cst_7 = arith.constant 5.000000e-01 : f32
    %23 = vector.broadcast %cst_7 : f32 to vector<8x256xf32>
    %24 = arith.addf %8, %23 : vector<8x256xf32>
    %25 = arith.mulf %24, %11 : vector<8x256xf32>
    %26 = arith.subf %6, %25 : vector<8x256xf32>
    %27 = arith.addf %26, %22 : vector<8x256xf32>
    %c0_8 = arith.constant 0 : index
    %c0_9 = arith.constant 0 : index
    %28 = vector.load %arg3[%c0_8, %c0_9] : memref<8x256xf32, #tpu.memory_space<vmem>>, vector<8x256xf32>
    tpu.vector_store %arg3[%c0_8, %c0_9], %27 {strides = array<i32>} : memref<8x256xf32, #tpu.memory_space<vmem>>, vector<8x256xf32>,
    return
  }
  func.func @transform_0(%arg0: i32) -> (i32, i32) {
    %c0_i32 = arith.constant 0 : i32
    %c0_i32_0 = arith.constant 0 : i32
    return %arg0, %c0_i32 : i32, i32
  }
  func.func @transform_1(%arg0: i32) -> (i32, i32) {
    %c0_i32 = arith.constant 0 : i32
    %c0_i32_0 = arith.constant 0 : i32
    return %arg0, %c0_i32 : i32, i32
  }
  func.func @transform_2(%arg0: i32) -> (i32, i32) {
    %c0_i32 = arith.constant 0 : i32
    %c0_i32_0 = arith.constant 0 : i32
    return %arg0, %c0_i32 : i32, i32
  }
}

</mosaic_0001>

<bundles_post_ra>
// kernel: tpu_custom_call.1
= control target key start
LH: loop header
LB: loop body
LE: loop exit
PB: predicated region body
PF: predicated region fallthrough
CT: control target
= control target key end

     0   :  { %7 = vsyncpa [#allocation3], 0  ;;  %s793_s0 = inlined_call_operand.hbm [shape: f32[16,256], index: 0, kind: input, shape index: {}]   ;;  %s794_s1 = inlined_call_operand.hbm [shape: f32[16,256], index: 1, kind: input, shape index: {}]   ;;  %s795_s2 = inlined_call_operand.hbm [shape: f32[16,256], index: 2, kind: output, shape index: {}]  }
   0x1   :  { %9 = vsyncpa [#allocation3 + $0x1], 0 }
   0x2   :  { %10 = vsyncpa [#allocation6], 0 }
   0x3   :  { %12 = vsyncpa [#allocation6 + $0x1], 0 }
   0x4   :  { %13 = vsyncpa [#allocation4], 0 }
   0x5   :  { %15 = vsyncpa [#allocation4 + $0x1], 0  ;;  %s579_s9 = smov 0   ;;  %s581_s10 = smov 0  }
   0x6   :  { %s583_s11 = smov 0   ;;  %s585_s12 = smov 0  }
   0x7 LB: > { %s600_s13 = sadd.s32 4294967295, %s559_s12   ;;  %s349_s14 = sadd.s32 4294967294, %s559_s12   ;;  %s559_s12 = sphi %s585_s12, %s814_s12   ;;  %s555_s11 = sphi %s583_s11, %s813_s11   ;;  %s551_s10 = sphi %s581_s10, %s812_s10   ;;  %s547_s9 = sphi %s579_s9, %s811_s9  }
   0x8   : > { %s604_s15 = sadd.s32 1, %s559_s12   ;;  %s28_s16 = sadd.s32 1, %s555_s11 }
   0x9   : > { %s25_s17 = ssub.s32 %s559_s12, %s604_s15  ;;  %p35_p0 = scmp.ne.s32.totalorder %s555_s11, %s551_s10 }
   0xa   : > { %p26_p1 = scmp.eq.s32.totalorder %s25_s17, 0  ;;  %p36_p2 = scmp.eq.s32.totalorder %s559_s12, 0 }
   0xb   : > { %p41_p3 = scmp.ne.s32.totalorder %s551_s10, %s547_s9  ;;  %p42_p4 = scmp.eq.s32.totalorder %s600_s13, 0 }
   0xc   : > { %s616_s18 = scalar_select %p26_p1, %s555_s11, %s28_s16  }
   0xd   : > { %p618_p5 = por %p36_p2, %p35_p0  ;;  %p622_p6 = por %p42_p4, %p41_p3 }
   0xe   : > { %p91_p7 = scmp.eq.s32.totalorder %s600_s13, 1  ;;  %p97_p8 = scmp.eq.s32.totalorder %s349_s14, 1 }
   0xf   : > { %s799_s20 = scalar_select %p622_p6, 1, 0 }
  0x10   : > { %p387_p10 = scmp.lt.s32.totalorder %s559_s12, 2  ;;  %p629_p11 = por %p91_p7, %p35_p0 }
  0x11   : > { %p633_p12 = por %p97_p8, %p41_p3  ;;  %s638_s23 = sand.u32 1, %s555_s11  }
  0x12   : > { %s800_s21 = scalar_select %p629_p11, 1, 0 }
  0x13   : > { %s801_s22 = scalar_select %p633_p12, 1, 0 }
  0x14   : > { %s367_s24 = sshll.u32 %s559_s12, 8  ;;  %s352_s25 = sshll.u32 %s638_s23, 4 }
  0x15   : > { %s647_s28 = scalar_lea.hbm %s793_s0, %s367_s24  ;;  %s121_s29 = scalar_lea.vmem [#allocation2], %s352_s25 }
  0x16   : > { %s129_s30 = sshll.u32 %s121_s29, 4  ;;  %p653_p13 = pnand %p387_p10, %p618_p5  ;;  %s657_s30 = int_to_ptr.vmem [resolvable:$true] %s129_s30 }
  0x17   : > { %s118_s4 = scalar_lea.sflag [#allocation3], %s638_s23  ;;  %s429_s5 = scalar_lea.hbm %s647_s28, 256 }
  0x18   : > { %p430_p2 = scmp.ne.s32.totalorder %s647_s28, %s429_s5  ;;  %p431_p3 = pneg %p653_p13 }
  0x19   : > { %s434_s8 = scalar_lea.hbm %s793_s0, 512  ;;  %p435_p5 = scmp.lt.u32.totalorder %s647_s28, %s793_s0 }
  0x1a   : > { %p432_p4 = pnand %p431_p3, %p430_p2  ;;  %p436_p8 = scmp.lt.u32.totalorder %s434_s8, %s429_s5 }
  0x1b   : > { %p438_p9 = scmp.lt.u32.totalorder %s429_s5, %s647_s28 }
  0x1c   : > { %p433_p7 = pneg %p432_p4  ;;  %p437_p10 = por %p436_p8, %p435_p5 }
  0x1e   : > { %p439_p0 = por %p438_p9, %p437_p10 }
  0x20   : > { %p440_p1 = pnand %p439_p0, %p433_p7 }
  0x22   : > { %443 = shalt.err (!%p440_p1)
}
  0x23   : > { %s444_s17 = scalar_lea.vmem %s657_s30, 256  ;;  %s561_s19 = smov [#allocation2]  }
  0x24   : > { %p445_p2 = scmp.ne.s32.totalorder %s657_s30, %s444_s17  ;;  %s449_s26 = sshll.u32 %s561_s19, 4  ;;  %s450_s26 = int_to_ptr.vmem [resolvable:$false] %s449_s26 }
  0x25   : > { %s451_s27 = scalar_lea.vmem %s450_s26, 512  ;;  %p452_p11 = scmp.lt.s32.totalorder %s657_s30, %s450_s26 }
  0x26   : > { %p447_p4 = pnand %p445_p2, %p431_p3  ;;  %p453_p5 = scmp.lt.s32.totalorder %s451_s27, %s444_s17 }
  0x28   : > { %p448_p12 = pneg %p447_p4  ;;  %p454_p8 = por %p453_p5, %p452_p11 }
  0x2a   : > { %p455_p9 = pnand %p454_p8, %p448_p12 }
  0x2c   : > { %458 = shalt.err (!%p455_p9)
}
  0x2d   : > { %379 = dma.hbm_to_vmem [thread:$0]  (!%p653_p13), %s647_s28, 256, %s657_s30, %s118_s4  }
  0x2e   : > { %p803_p0 = scmp.lt.s32.totalorder %s559_s12, 3  ;;  %p804_p1 = scmp.ge.s32.totalorder %s559_s12, 1 }
  0x2f   : > { %s700_s7 = scalar_lea.hbm %s794_s1, %s367_s24  ;;  %s140_s8 = scalar_lea.vmem [#allocation5], %s352_s25 }
  0x30   : > { %p691_p7 = pnand %p804_p1, %p803_p0  ;;  %s148_s14 = sshll.u32 %s140_s8, 4  ;;  %s149_s14 = int_to_ptr.vmem [resolvable:$true] %s148_s14 }
  0x31   : > { %s137_s28 = scalar_lea.sflag [#allocation6], %s638_s23  ;;  %s459_s30 = scalar_lea.hbm %s700_s7, 256 }
  0x32   : > { %s805_s29 = scalar_select %p691_p7, 1, 0 }
  0x33   : > { %p460_p11 = scmp.ne.s32.totalorder %s700_s7, %s459_s30  ;;  %s464_s24 = scalar_lea.hbm %s794_s1, 512 }
  0x34   : > { %p465_p2 = scmp.lt.u32.totalorder %s700_s7, %s794_s1  ;;  %p466_p4 = scmp.lt.u32.totalorder %s464_s24, %s459_s30 }
  0x35   : > { %p462_p12 = pnand %p460_p11, %p431_p3  ;;  %p468_p8 = scmp.lt.u32.totalorder %s459_s30, %s700_s7 }
  0x36   : > { %p467_p5 = por %p466_p4, %p465_p2 }
  0x37   : > { %p463_p10 = pneg %p462_p12 }
  0x38   : > { %p469_p9 = por %p468_p8, %p467_p5 }
  0x3a   : > { %p470_p0 = pnand %p469_p9, %p463_p10 }
  0x3c   : > { %473 = shalt.err (!%p470_p0)
}
  0x3d   : > { %s474_s23 = scalar_lea.vmem %s149_s14, 256  ;;  %s562_s25 = smov [#allocation5]  }
  0x3e   : > { %p475_p1 = scmp.ne.s32.totalorder %s149_s14, %s474_s23  ;;  %s479_s26 = sshll.u32 %s562_s25, 4  ;;  %s480_s26 = int_to_ptr.vmem [resolvable:$false] %s479_s26 }
  0x3f   : > { %s481_s27 = scalar_lea.vmem %s480_s26, 512  ;;  %p482_p6 = scmp.lt.s32.totalorder %s149_s14, %s480_s26 }
  0x40   : > { %p477_p11 = pnand %p475_p1, %p431_p3  ;;  %p483_p7 = scmp.lt.s32.totalorder %s481_s27, %s474_s23 }
  0x42   : > { %p478_p12 = pneg %p477_p11  ;;  %p484_p2 = por %p483_p7, %p482_p6 }
  0x44   : > { %p485_p4 = pnand %p484_p2, %p478_p12 }
  0x46   : > { %488 = shalt.err (!%p485_p4)
}
  0x47   : > { %382 = dma.hbm_to_vmem [thread:$0]  (!%p653_p13), %s700_s7, 256, %s149_s14, %s137_s28  }
  0x48   : > { %p806_p10 = scmp.ne.s32.totalorder %s805_s29, 0 }
  0x49   : > { %s727_s5 = sand.u32 (!%p806_p10), 1, %s551_s10   ;;  %p807_p6 = scmp.ne.s32.totalorder (!%p806_p10), %s799_s20, 0 }
  0x4a   : > { %157 = sbr.rel (%p806_p10) target bundleno = 125 (0x7d), region = 28  ;;  %s730_s6 = sshll.u32 (!%p806_p10), %s727_s5, 4 }
  0x4b   : > { %s160_s8 = scalar_lea.sflag (!%p806_p10), [#allocation3], %s727_s5  ;;  %s163_s30 = scalar_lea.vmem (!%p806_p10), [#allocation2], %s730_s6 }
  0x51   : > { %534 = dma.done.wait (%p807_p6), %s160_s8, 256  }
  0x52   : > { %536 = vsyncadd (%p807_p6), %s160_s8, 4294967040  ;;  %s169_s3 = scalar_lea.sflag [#allocation6], %s727_s5  ;;  %s172_s29 = scalar_lea.vmem [#allocation5], %s730_s6 }
  0x53   : > { %538 = dma.done.wait (%p807_p6), %s169_s3, 256  }
  0x54   : > { %540 = vsyncadd (%p807_p6), %s169_s3, 4294967040  ;;  %v201_v0 = vld [vmem:[%s163_s30] sm:$0xff]  ;;  %v202_v2 = vld [vmem:[%s163_s30 + $0x8] sm:$0xff]  ;;  %s197_s20 = scalar_lea.vmem [#allocation7], %s730_s6  ;;  %s369_s14 = sshll.u32 %s600_s13, 8 }
  0x55   : > { %v205_v1 = vld [vmem:[%s172_s29] sm:$0xff]  ;;  %v207_v3 = vmax.f32 %v201_v0, 0.01  ;;  %v206_v5 = vld [vmem:[%s172_s29 + $0x8] sm:$0xff]  ;;  %v208_v6 = vmax.f32 %v202_v2, 0.01  ;;  %s751_s16 = scalar_lea.hbm %s795_s2, %s369_s14 }
  0x56   : > { %v209_v4 = vmax.f32 %v205_v1, 0.01  ;;  %v210_v7 = vmax.f32 %v206_v5, 0.01  ;;  %s256_s7 = sshll.u32 %s197_s20, 4  ;;  %s242_s24 = scalar_lea.sflag [#allocation4], %s727_s5  ;;  %s746_s7 = int_to_ptr.vmem [resolvable:$true] %s256_s7 }
  0x57   : > { %v211_v8 = vadd.f32 1e-08, %v207_v3  ;;  %v212_v9 = vadd.f32 1e-08, %v208_v6  ;;  %s489_s17 = scalar_lea.vmem %s746_s7, 256  ;;  %p808_p3 = scmp.ne.s32.totalorder %s800_s21, 0 }
  0x58   : > { %421 = vlog2.f32 %v209_v4  ;;  %v223_v10 = vadd.f32 0.5, %v209_v4  ;;  %v224_v12 = vadd.f32 0.5, %v210_v7  ;;  %vm221_vm0 = vcmp.gt.f32.partialorder %v209_v4, 1.0  ;;  %p490_p13 = scmp.ne.s32.totalorder %s746_s7, %s489_s17  ;;  %s563_s13 = smov [#allocation7]  }
  0x59   : > { %423 = vlog2.f32 %v210_v7  ;;  %vm222_vm1 = vcmp.gt.f32.partialorder %v210_v7, 1.0  ;;  %s493_s19 = sshll.u32 %s563_s13, 4  ;;  %s494_s19 = int_to_ptr.vmem [resolvable:$false] %s493_s19 }
  0x5a   : > { %425 = vlog2.f32 %v211_v8  ;;  %p491_p7 = pnand %p490_p13, %p808_p3  ;;  %s495_s23 = scalar_lea.vmem %s494_s19, 512 }
  0x5b   : > { %427 = vlog2.f32 %v212_v9  ;;  %p496_p8 = scmp.lt.s32.totalorder %s746_s7, %s494_s19  ;;  %p497_p9 = scmp.lt.s32.totalorder %s495_s23, %s489_s17 }
  0x5c   : > { %p492_p5 = pneg %p491_p7 }
  0x5d   : > { %p498_p0 = por %p497_p9, %p496_p8 }
  0x5f   : > { %p499_p1 = pnand %p498_p0, %p492_p5 }
  0x62   : > { %v422_v11 = vpop.eup %421 }
  0x63   : > { %v424_v13 = vpop.eup %423  ;;  %v218_v14 = vmul.f32 0.6931472, %v422_v11 }
  0x64   : > { %v426_v15 = vpop.eup %425  ;;  %v220_v16 = vmul.f32 0.6931472, %v424_v13 }
  0x65   : > { %v428_v17 = vpop.eup %427  ;;  %v214_v18 = vmul.f32 0.6931472, %v426_v15  ;;  %v225_v19 = vmul.f32 %v223_v10, %v218_v14 }
  0x66   : > { %v216_v20 = vmul.f32 0.6931472, %v428_v17  ;;  %v226_v21 = vmul.f32 %v224_v12, %v220_v16 }
  0x67   : > { %v227_v22 = vsub.f32 %v225_v19, %v209_v4  ;;  %v233_v23 = vmul.f32 %v223_v10, %v214_v18 }
  0x68   : > { %v228_v24 = vsub.f32 %v226_v21, %v210_v7  ;;  %v234_v25 = vmul.f32 %v224_v12, %v216_v20 }
  0x69   : > { %v229_v26 = vadd.f32 0.9189385, %v227_v22  ;;  %v235_v27 = vsub.f32 %v207_v3, %v233_v23 }
  0x6a   : > { %v230_v28 = vadd.f32 0.9189385, %v228_v24  ;;  %v236_v29 = vsub.f32 %v208_v6, %v234_v25 }
  0x6b   : > { %v231_v30 = vsel %vm221_vm0, %v229_v26, 0.0 }
  0x6c   : > { %v237_v31 = vadd.f32 %v235_v27, %v231_v30  ;;  %v232_v32 = vsel %vm222_vm1, %v230_v28, 0.0 }
  0x6d   : > { %v238_v33 = vadd.f32 %v236_v29, %v232_v32 }
  0x6e   : > { %239 = vst [vmem:[%s197_s20] sm:$0xff] %v237_v31 }
  0x6f   : > { %240 = vst [vmem:[%s197_s20 + $0x8] sm:$0xff] %v238_v33 }
  0x70   : > { %502 = shalt.err (!%p499_p1)
}
  0x71   : > { %s503_s25 = scalar_lea.hbm %s751_s16, 256  ;;  %s507_s5 = scalar_lea.hbm %s795_s2, 512 }
  0x72   : > { %p504_p11 = scmp.ne.s32.totalorder %s751_s16, %s503_s25  ;;  %p508_p4 = scmp.lt.u32.totalorder %s751_s16, %s795_s2 }
  0x73   : > { %p509_p10 = scmp.lt.u32.totalorder %s507_s5, %s503_s25  ;;  %p511_p13 = scmp.lt.u32.totalorder %s503_s25, %s751_s16 }
  0x74   : > { %p505_p12 = pnand %p504_p11, %p808_p3 }
  0x75   : > { %p510_p6 = por %p509_p10, %p508_p4 }
  0x76   : > { %p506_p2 = pneg %p505_p12 }
  0x77   : > { %p512_p7 = por %p511_p13, %p510_p6 }
  0x79   : > { %p513_p5 = pnand %p512_p7, %p506_p2 }
  0x7b   : > { %516 = shalt.err (!%p513_p5)
}
  0x7c   : > { %374 = dma.vmem_to_hbm [thread:$0]  (%p808_p3), %s746_s7, 256, %s751_s16, %s242_s24  }
  0x7d PF: > { %s268_s30 = sand.u32 1, %s547_s9   ;;  %p809_p8 = scmp.ne.s32.totalorder %s801_s22, 0 }
  0x7e   : > { %p810_p9 = scmp.ge.s32.totalorder %s559_s12, 2  ;;  %s269_s3 = scalar_lea.sflag [#allocation4], %s268_s30 }
  0x80   : > { %p384_p0 = pnand %p810_p9, %p809_p8 }
  0x82   : > { %542 = dma.done.wait (!%p384_p0), %s269_s3, 256  }
  0x83   : > { %544 = vsyncadd (!%p384_p0), %s269_s3, 4294967040  ;;  %p18_p1 = scmp.ge.s32.totalorder %s604_s15, 4   ;;  %s811_s9 = smov %s551_s10 }
  0x84   : > { %s812_s10 = smov %s555_s11  ;;  %s813_s11 = smov %s616_s18 }
  0x85   : > { %s814_s12 = smov %s604_s15  ;;  %20 = sbr.rel (!%p18_p1) target bundleno = 7 (0x7), region = 88 }
  0x8c   :  { %274 = vsyncpa [#allocation3], 1 }
  0x8d   :  { %276 = vsyncpa [#allocation3 + $0x1], 1 }
  0x8e   :  { %277 = vsyncpa [#allocation6], 1 }
  0x8f   :  { %279 = vsyncpa [#allocation6 + $0x1], 1 }
  0x90   :  { %280 = vsyncpa [#allocation4], 1 }
  0x91   :  { %282 = vsyncpa [#allocation4 + $0x1], 1 }

</bundles_post_ra>
